<compile_context>
chip_gen: v6e
topology: v6e:2x2x1
jax: 0.10.0
libtpu: 0.0.40
codegen_flags: <defaults>
</compile_context>

<pallas_src>
import functools

import jax
import jax.numpy as jnp
from jax.experimental import pallas as pl
from jax.experimental.pallas import tpu as pltpu

HIDDEN = 16                 # hidden_size in the PyTorch module
LANES = 128                 # TPU lane width
PACK = LANES // HIDDEN      # 8 logical rows packed into one lane-dense row

FAST_PATH_PACKED_ROWS = 1024   # <= 512 KiB of x: single grid-less block
TILE_M_PACKED = 4096           # 2 MiB per (input|output) block in the grid path


def _round_up(x: int, m: int) -> int:
    return ((x + m - 1) // m) * m


def _packed_linear_kernel(x_ref, w_ref, b_ref, o_ref):
    # x_ref: [TM, 128] (8 logical rows of width 16 packed per lane-dense row)
    # w_ref: [128, 128] = kron(I_8, W.T)  (block-diagonal, [K, N] layout)
    # b_ref: [1, 128]   = tile(bias, 8)
    # o_ref: [TM, 128]
    acc = jnp.dot(x_ref[...], w_ref[...], preferred_element_type=jnp.float32)
    o_ref[...] = (acc + b_ref[...]).astype(o_ref.dtype)


def linear_pallas(x2d: jax.Array, w_pack: jax.Array, b_pack: jax.Array) -> jax.Array:
    """y = x2d @ W.T + b using a lane-packed Pallas TPU kernel.

    x2d:    [M, 16] float32
    w_pack: [128, 128]  == kron(I_8, W.T)     (built once at init)
    b_pack: [1, 128]    == tile(bias, 8)      (built once at init)
    """
    M, H = x2d.shape
    assert H == HIDDEN

    # Pad M to a multiple of PACK so the [M,16] -> [M/8,128] view is exact.
    Mp = _round_up(M, PACK)
    if Mp != M:
        x2d = jnp.pad(x2d, ((0, Mp - M), (0, 0)))
    m_packed = Mp // PACK
    xp = x2d.reshape(m_packed, LANES)   # free contiguous reshape

    if m_packed <= FAST_PATH_PACKED_ROWS:
        # Tiny working set: one grid-less invocation, whole arrays in VMEM,
        # no pipeline prologue/epilogue or double buffering.
        yp = pl.pallas_call(
            _packed_linear_kernel,
            out_shape=jax.ShapeDtypeStruct((m_packed, LANES), x2d.dtype),
            in_specs=[
                pl.BlockSpec(memory_space=pltpu.MemorySpace.VMEM),
                pl.BlockSpec(memory_space=pltpu.MemorySpace.VMEM),
                pl.BlockSpec(memory_space=pltpu.MemorySpace.VMEM),
            ],
            out_specs=pl.BlockSpec(memory_space=pltpu.MemorySpace.VMEM),
        )(xp, w_pack, b_pack)
    else:
        # Large-M streaming path: tall lane-dense row tiles, W/bias VMEM-
        # resident (constant index_maps), >=2 grid steps so v7x's two
        # TensorCores both get work on the "parallel" axis.
        tm = min(TILE_M_PACKED, _round_up(pl.cdiv(m_packed, 2), 8))
        grid = (pl.cdiv(m_packed, tm),)
        yp = pl.pallas_call(
            _packed_linear_kernel,
            out_shape=jax.ShapeDtypeStruct((m_packed, LANES), x2d.dtype),
            grid_spec=pl.GridSpec(
                grid=grid,
                in_specs=[
                    pl.BlockSpec((tm, LANES), lambda i: (i, 0)),
                    pl.BlockSpec((LANES, LANES), lambda i: (0, 0)),
                    pl.BlockSpec((1, LANES), lambda i: (0, 0)),
                ],
                out_specs=pl.BlockSpec((tm, LANES), lambda i: (i, 0)),
            ),
            compiler_params=pltpu.CompilerParams(
                dimension_semantics=("parallel",),
                vmem_limit_bytes=32 * 1024 * 1024,
            ),
        )(xp, w_pack, b_pack)

    y2d = yp.reshape(Mp, HIDDEN)
    if Mp != M:
        y2d = y2d[:M]
    return y2d


class MyModelPallas:
    """JAX/Pallas port of apex's MyModel (a single Linear(hidden, hidden))."""

    def __init__(self, key: jax.Array, pre_process: bool = False,
                 post_process: bool = False):
        self.pre_process = pre_process
        self.post_process = post_process
        self.input_tensor = None
        kw, kb = jax.random.split(key)
        # Deterministic init mimicking nn.Linear's uniform(-1/sqrt(H), 1/sqrt(H)).
        bound = 1.0 / (HIDDEN ** 0.5)
        # PyTorch layout (out_features, in_features) kept as the reference params.
        self.weight = jax.random.uniform(
            kw, (HIDDEN, HIDDEN), jnp.float32, minval=-bound, maxval=bound)
        self.bias = jax.random.uniform(
            kb, (HIDDEN,), jnp.float32, minval=-bound, maxval=bound)
        # Lane-packed kernel parameters, built ONCE:
        #   W_pack = kron(I_8, W.T)  (block-diagonal [128,128], [K,N] layout)
        #   b_pack = tile(b, 8)      ([1,128])
        eye = jnp.eye(PACK, dtype=self.weight.dtype)
        self._w_pack = jnp.kron(eye, self.weight.T)
        self._b_pack = jnp.tile(self.bias, PACK).reshape(1, LANES)

    def set_input_tensor(self, input_tensor):
        self.input_tensor = input_tensor

    def __call__(self, x):
        inp = x if self.input_tensor is None else self.input_tensor
        if inp is None:
            raise ValueError("No input: both x and input_tensor are None.")
        orig_shape = inp.shape
        x2d = inp.reshape(-1, HIDDEN)
        y2d = linear_pallas(x2d, self._w_pack, self._b_pack)
        return y2d.reshape(orig_shape)


if __name__ == "__main__":
    key = jax.random.PRNGKey(0)
    k_model, k_x, k_big, k_huge = jax.random.split(key, 4)

    model = MyModelPallas(k_model)

    def reference(x):
        return x @ model.weight.T + model.bias

    # Small input: [seq=8, batch=2, hidden=16]  (M=16 -> grid-less fast path)
    x = jax.random.normal(k_x, (8, 2, HIDDEN), jnp.float32)
    y = model(x)
    jax.block_until_ready(y)
    assert y.shape == x.shape
    assert jnp.allclose(y, reference(x), atol=1e-5, rtol=1e-5)

    # Exercise the set_input_tensor path (pipeline-parallel semantics).
    model.set_input_tensor(x * 2.0)
    y2 = model(None)
    jax.block_until_ready(y2)
    assert jnp.allclose(y2, reference(x * 2.0), atol=1e-5, rtol=1e-5)
    model.set_input_tensor(None)

    # Medium input: [seq=128, batch=16, hidden=16] -> M=2048 (still fast path).
    xb = jax.random.normal(k_big, (128, 16, HIDDEN), jnp.float32)
    yb = model(xb)
    jax.block_until_ready(yb)
    assert jnp.allclose(yb, reference(xb), atol=1e-5, rtol=1e-5)

    # Larger input to exercise the tiled/pipelined grid path:
    # [seq=512, batch=64, hidden=16] -> M=32768 -> 4096 packed rows -> grid of 2.
    xh = jax.random.normal(k_huge, (512, 64, HIDDEN), jnp.float32)
    yh = model(xh)
    jax.block_until_ready(yh)
    assert jnp.allclose(yh, reference(xh), atol=1e-4, rtol=1e-5)

    print("KERNEL_OK")
</pallas_src>

<mosaic_0001>
module attributes {stable_mosaic.version = 11 : i64} {
  func.func @_packed_linear_kernel(%arg0: memref<2x128xf32, #tpu.memory_space<vmem>>, %arg1: memref<128x128xf32, #tpu.memory_space<vmem>>, %arg2: memref<1x128xf32, #tpu.memory_space<vmem>>, %arg3: memref<2x128xf32, #tpu.memory_space<vmem>>) attributes {dimension_semantics = [], scalar_prefetch = 0 : i64, scratch_operands = 0 : i64, tpu.core_type = #tpu.core_type<tc>} {
    %c0 = arith.constant 0 : index
    %c0_0 = arith.constant 0 : index
    %0 = vector.load %arg0[%c0, %c0_0] : memref<2x128xf32, #tpu.memory_space<vmem>>, vector<2x128xf32>
    %c0_1 = arith.constant 0 : index
    %c0_2 = arith.constant 0 : index
    %1 = vector.load %arg1[%c0_1, %c0_2] : memref<128x128xf32, #tpu.memory_space<vmem>>, vector<128x128xf32>
    %cst = arith.constant dense<0.000000e+00> : vector<2x128xf32>
    %2 = tpu.matmul %0, %1, %cst {dimension_numbers = #tpu.dot_dimension_numbers<[1], [0], [0], [1], [0, 0, 1, 1], [], []>} : vector<2x128xf32>, vector<128x128xf32>, vector<2x128xf32> -> vector<2x128xf32>
    %c0_3 = arith.constant 0 : index
    %c0_4 = arith.constant 0 : index
    %3 = vector.load %arg2[%c0_3, %c0_4] : memref<1x128xf32, #tpu.memory_space<vmem>>, vector<1x128xf32>
    %4 = vector.broadcast %3 : vector<1x128xf32> to vector<2x128xf32>
    %5 = arith.addf %2, %4 : vector<2x128xf32>
    %c0_5 = arith.constant 0 : index
    %c0_6 = arith.constant 0 : index
    %6 = vector.load %arg3[%c0_5, %c0_6] : memref<2x128xf32, #tpu.memory_space<vmem>>, vector<2x128xf32>
    tpu.vector_store %arg3[%c0_5, %c0_6], %5 {strides = array<i32>} : memref<2x128xf32, #tpu.memory_space<vmem>>, vector<2x128xf32>,
    return
  }
}

</mosaic_0001>

<bundles_post_ra>
// kernel: tpu_custom_call.1
= control target key start
LH: loop header
LB: loop body
LE: loop exit
PB: predicated region body
PF: predicated region fallthrough
CT: control target
= control target key end

     0   :  { %8 = vsyncpa [#allocation3], 0  ;;  %s317_s0 = inlined_call_operand.hbm [shape: f32[2,128], index: 0, kind: input, shape index: {}]   ;;  %s318_s1 = inlined_call_operand.hbm [shape: f32[128,128], index: 1, kind: input, shape index: {}]   ;;  %s319_s2 = inlined_call_operand.vmem [shape: f32[1,128], index: 2, kind: input, shape index: {}]   ;;  %s320_s3 = inlined_call_operand.hbm [shape: f32[2,128], index: 3, kind: output, shape index: {}]  }
   0x1   :  { %9 = vsyncpa [#allocation6], 0 }
   0x2   :  { %10 = vsyncpa [#allocation4], 0  ;;  %s278_s12 = smov [#allocation2]   ;;  %s279_s14 = smov [#allocation5]  }
   0x3   :  { %s17_s13 = sshll.u32 %s278_s12, 4  ;;  %s26_s15 = sshll.u32 %s279_s14, 4  ;;  %s18_s13 = int_to_ptr.vmem [resolvable:$true] %s17_s13  ;;  %s27_s15 = int_to_ptr.vmem [resolvable:$true] %s26_s15 }
   0x4   :  { %s220_s16 = scalar_lea.vmem %s18_s13, 32  ;;  %p225_p1 = scmp.lt.s32.totalorder %s18_s13, %s18_s13 }
   0x5   :  { %p221_p0 = scmp.ne.s32.totalorder %s18_s13, %s220_s16  ;;  %p226_p2 = scmp.lt.s32.totalorder %s220_s16, %s220_s16 }
   0x7   :  { %p227_p3 = por %p226_p2, %p225_p1 }
   0x9   :  { %p228_p4 = pnand %p227_p3, %p221_p0 }
   0xb   :  { %231 = shalt.err (!%p228_p4)
}
   0xc   :  { %20 = dma.hbm_to_vmem [thread:$0]  %s317_s0, 32, %s18_s13, [#allocation3]  }
   0xd   :  { %s240_s19 = scalar_lea.vmem %s27_s15, 2048  ;;  %p245_p6 = scmp.lt.s32.totalorder %s27_s15, %s27_s15 }
   0xe   :  { %p241_p5 = scmp.ne.s32.totalorder %s27_s15, %s240_s19  ;;  %p246_p7 = scmp.lt.s32.totalorder %s240_s19, %s240_s19 }
  0x10   :  { %p247_p8 = por %p246_p7, %p245_p6 }
  0x12   :  { %p248_p9 = pnand %p247_p8, %p241_p5 }
  0x14   :  { %251 = shalt.err (!%p248_p9)
}
  0x15   :  { %s280_s20 = smov 128   ;;  %s281_s21 = smov 8  }
  0x16   :  { %32 = dma.hbm_to_vmem [thread:$0]  %s318_s1, 2048, %s27_s15, [#allocation6], %s280_s20, %s280_s20, %s281_s21  }
  0x17   :  { %272 = dma.done.wait [#allocation3], 32  }
  0x18   :  { %273 = vsyncadd [#allocation3], 4294967264 }
  0x19   :  { %274 = dma.done.wait [#allocation6], 2048  }
  0x1a   :  { %275 = vsyncadd [#allocation6], 4294965248  ;;  %v282_v0 = vmov 0.0   ;;  %vm283_vm0 = vmmov 0   ;;  %v57_v1 = vld [vmem:[#allocation5 + $0x78] sm:$0xff]  ;;  %v56_v2 = vld [vmem:[#allocation5 + $0x70] sm:$0xff] }
  0x1b   :  { %170 = vmatprep.subr.mxu0 %v282_v0  ;;  %202 = vmatprep.mubr.msk.f32.mxu0 %vm283_vm0, %v282_v0  ;;  %v55_v3 = vld [vmem:[#allocation5 + $0x68] sm:$0xff]  ;;  %v54_v4 = vld [vmem:[#allocation5 + $0x60] sm:$0xff]  ;;  %v53_v5 = vld [vmem:[#allocation5 + $0x58] sm:$0xff]  ;;  %s284_s24 = smov [#allocation7]  }
  0x1c   :  { %171 = vmatpush3.msra.mxu0 %v57_v1  ;;  %v52_v6 = vld [vmem:[#allocation5 + $0x50] sm:$0xff]  ;;  %v51_v7 = vld [vmem:[#allocation5 + $0x48] sm:$0xff]  ;;  %v50_v8 = vld [vmem:[#allocation5 + $0x40] sm:$0xff]  ;;  %s142_s25 = sshll.u32 %s284_s24, 4  ;;  %s143_s25 = int_to_ptr.vmem [resolvable:$true] %s142_s25 }
  0x1d   :  { %172 = vmatprep.subr.mxu0 %v282_v0  ;;  %v49_v9 = vld [vmem:[#allocation5 + $0x38] sm:$0xff]  ;;  %v48_v10 = vld [vmem:[#allocation5 + $0x30] sm:$0xff]  ;;  %v47_v11 = vld [vmem:[#allocation5 + $0x28] sm:$0xff]  ;;  %s252_s26 = scalar_lea.vmem %s143_s25, 32  ;;  %p257_p11 = scmp.lt.s32.totalorder %s143_s25, %s143_s25 }
  0x1e   :  { %173 = vmatpush3.msra.mxu0 %v56_v2  ;;  %v46_v12 = vld [vmem:[#allocation5 + $0x20] sm:$0xff]  ;;  %v45_v13 = vld [vmem:[#allocation5 + $0x18] sm:$0xff]  ;;  %v44_v14 = vld [vmem:[#allocation5 + $0x10] sm:$0xff]  ;;  %p253_p10 = scmp.ne.s32.totalorder %s143_s25, %s252_s26  ;;  %p258_p12 = scmp.lt.s32.totalorder %s252_s26, %s252_s26 }
  0x1f   :  { %174 = vmatprep.subr.mxu0 %v282_v0  ;;  %v43_v15 = vld [vmem:[#allocation5 + $0x8] sm:$0xff]  ;;  %v42_v16 = vld [vmem:[#allocation5] sm:$0xff]  ;;  %v41_v17 = vld [vmem:[#allocation2] sm:$0x3] }
  0x20   :  { %175 = vmatpush3.msra.mxu0 %v55_v3  ;;  %v152_v18 = vld [vmem:[%s319_s2] ss:$0 sm:$0xff]  ;;  %p259_p13 = por %p258_p12, %p257_p11 }
  0x21   :  { %176 = vmatprep.subr.mxu0 %v282_v0 }
  0x22   :  { %177 = vmatpush3.msra.mxu0 %v54_v4  ;;  %p260_p0 = pnand %p259_p13, %p253_p10 }
  0x23   :  { %178 = vmatprep.subr.mxu0 %v282_v0 }
  0x24   :  { %179 = vmatpush3.msra.mxu0 %v53_v5 }
  0x25   :  { %180 = vmatprep.subr.mxu0 %v282_v0 }
  0x26   :  { %181 = vmatpush3.msra.mxu0 %v52_v6 }
  0x27   :  { %182 = vmatprep.subr.mxu0 %v282_v0 }
  0x28   :  { %183 = vmatpush3.msra.mxu0 %v51_v7 }
  0x29   :  { %184 = vmatprep.subr.mxu0 %v282_v0 }
  0x2a   :  { %185 = vmatpush3.msra.mxu0 %v50_v8 }
  0x2b   :  { %186 = vmatprep.subr.mxu0 %v282_v0 }
  0x2c   :  { %187 = vmatpush3.msra.mxu0 %v49_v9 }
  0x2d   :  { %188 = vmatprep.subr.mxu0 %v282_v0 }
  0x2e   :  { %189 = vmatpush3.msra.mxu0 %v48_v10 }
  0x2f   :  { %190 = vmatprep.subr.mxu0 %v282_v0 }
  0x30   :  { %191 = vmatpush3.msra.mxu0 %v47_v11 }
  0x31   :  { %192 = vmatprep.subr.mxu0 %v282_v0 }
  0x32   :  { %193 = vmatpush3.msra.mxu0 %v46_v12 }
  0x33   :  { %194 = vmatprep.subr.mxu0 %v282_v0 }
  0x34   :  { %195 = vmatpush3.msra.mxu0 %v45_v13 }
  0x35   :  { %196 = vmatprep.subr.mxu0 %v282_v0 }
  0x36   :  { %197 = vmatpush3.msra.mxu0 %v44_v14 }
  0x37   :  { %198 = vmatprep.subr.mxu0 %v282_v0 }
  0x38   :  { %199 = vmatpush3.msra.mxu0 %v43_v15 }
  0x39   :  { %200 = vmatprep.subr.mxu0 %v282_v0 }
  0x3a   :  { %201 = vmatpush3.msra.mxu0 %v42_v16 }
  0x3b   :  { %203 = vmatmul.mubr.f32.vlgmr.msra.gmra.mxu0 %v41_v17 }
  0xfb   :  { %v131_v19 = vpop.f32.mrf.mxu0 }
  0xfc   :  { %v132_v20 = vadd.f32 %v152_v18, %v131_v19 }
  0xfd   :  { %v204_v21 = vpop.f32.mrf.mxu0 }
  0xfe   :  { %135 = vst [vmem:[#allocation7] sm:$0x3] %v132_v20 }
  0xff   :  { %263 = shalt.err (!%p260_p0)
}
 0x100   :  { %145 = dma.vmem_to_hbm [thread:$0]  %s143_s25, 32, %s320_s3, [#allocation4]  }
 0x101   :  { %276 = dma.done.wait [#allocation4], 32  }
 0x102   :  { %277 = vsyncadd [#allocation4], 4294967264 }
 0x103   :  { %149 = vsyncpa [#allocation3], 1 }
 0x104   :  { %150 = vsyncpa [#allocation6], 1 }
 0x105   :  { %151 = vsyncpa [#allocation4], 1 }

</bundles_post_ra>
